<compile_context>
chip_gen: v5e
topology: v5e:2x2
jax: 0.10.0
libtpu: 0.0.40
codegen_flags: <defaults>
</compile_context>

<pallas_src>
import functools

import jax
import jax.numpy as jnp
from jax import lax
from jax.experimental import pallas as pl
from jax.experimental.pallas import tpu as pltpu


def _round_up(x: int, m: int) -> int:
    return ((x + m - 1) // m) * m


def _make_linear_kernel(compute_dtype):
    def kernel(x_ref, w_ref, o_ref, acc_ref):
        # Grid: (batch_block, n_block, k_block); K is the innermost reduction axis.
        @pl.when(pl.program_id(2) == 0)
        def _init():
            acc_ref[...] = jnp.zeros_like(acc_ref)

        x = x_ref[...]          # (tile_b, tile_k)
        w = w_ref[...]          # (tile_n, tile_k) -- PyTorch (out, in) layout, untransposed
        if compute_dtype is not None:
            x = x.astype(compute_dtype)
            w = w.astype(compute_dtype)

        # out[b, n] += sum_k x[b, k] * w[n, k]  (contraction done on the MXU, f32 acc)
        acc_ref[...] += lax.dot_general(
            x, w,
            dimension_numbers=(((1,), (1,)), ((), ())),
            preferred_element_type=jnp.float32,
        )

        @pl.when(pl.program_id(2) == pl.num_programs(2) - 1)
        def _finish():
            o_ref[...] = acc_ref[...].astype(o_ref.dtype)

    return kernel


def linear_header_forward(x, weight, label=None, *,
                          tile_b=None, tile_n=None, tile_k=None,
                          compute_dtype=None, use_pallas=None):
    """Equivalent of LinearHeader.forward(input, label) -> input @ weight.T.

    x:      (B, in_features)
    weight: (out_features, in_features)  (PyTorch nn.Linear convention, NOT transposed)
    label:  ignored (matches the reference module semantics)
    compute_dtype: optionally cast matmul inputs (e.g. jnp.bfloat16) while keeping
                   f32 accumulation; default keeps the input dtype.
    """
    B, K = x.shape
    N, K2 = weight.shape
    assert K == K2, "in_features mismatch"
    out_dtype = x.dtype

    # Tiny-problem fallback: a standalone pallas_call is pure launch/grid overhead
    # for a few-hundred-FLOP matmul.  Caller can force the Pallas path with use_pallas=True.
    if use_pallas is None:
        use_pallas = (2 * B * K * N) >= (1 << 20)
    if not use_pallas:
        return jnp.dot(x, weight.T).astype(out_dtype)

    # ---- tile selection (lane-dense: last dims multiples of 128) ----
    if tile_k is None:
        tile_k = min(512, _round_up(K, 128))
    if tile_n is None:
        tile_n = min(256, _round_up(N, 128))
    Np = _round_up(N, tile_n)
    n_blocks = Np // tile_n

    Bp8 = _round_up(B, 8)
    if tile_b is None:
        tile_b = min(256, Bp8)
        b_blocks = -(-Bp8 // tile_b)
        # Make sure there are >=2 parallel blocks so both v7x TensorCores get work.
        if Bp8 >= 16 and b_blocks * n_blocks < 2:
            tile_b = _round_up(-(-Bp8 // 2), 8)
    Bp = _round_up(Bp8, tile_b)
    Kp = _round_up(K, tile_k)

    # ---- zero-pad unaligned shapes so every block is full (no-op when aligned) ----
    xp = x if (Bp == B and Kp == K) else jnp.pad(x, ((0, Bp - B), (0, Kp - K)))
    wp = weight if (Np == N and Kp == K) else jnp.pad(weight, ((0, Np - N), (0, Kp - K)))

    grid = (Bp // tile_b, Np // tile_n, Kp // tile_k)

    itemsize_in = jnp.dtype(xp.dtype).itemsize
    cost = pl.CostEstimate(
        flops=2 * Bp * Np * Kp,
        transcendentals=0,
        bytes_accessed=(Bp * Kp + Np * Kp) * itemsize_in
        + Bp * Np * jnp.dtype(out_dtype).itemsize,
    )

    out_padded = pl.pallas_call(
        _make_linear_kernel(compute_dtype),
        out_shape=jax.ShapeDtypeStruct((Bp, Np), out_dtype),
        grid_spec=pltpu.PrefetchScalarGridSpec(
            num_scalar_prefetch=0,
            grid=grid,
            in_specs=[
                pl.BlockSpec((tile_b, tile_k), lambda i, j, k: (i, k)),   # x
                pl.BlockSpec((tile_n, tile_k), lambda i, j, k: (j, k)),   # weight (N, K)
            ],
            out_specs=pl.BlockSpec((tile_b, tile_n), lambda i, j, k: (i, j)),
            scratch_shapes=[pltpu.VMEM((tile_b, tile_n), jnp.float32)],
        ),
        compiler_params=pltpu.CompilerParams(
            dimension_semantics=("parallel", "parallel", "arbitrary"),
        ),
        cost_estimate=cost,
    )(xp, wp)

    if Bp == B and Np == N:
        return out_padded
    return out_padded[:B, :N]


if __name__ == "__main__":
    key = jax.random.PRNGKey(0)
    kx, kw, kl, kx2, kw2 = jax.random.split(key, 5)

    # Case 1: small shapes consistent with the module (batch=8, in=32, out=16).
    B, IN_F, OUT_F = 8, 32, 16
    x = jax.random.normal(kx, (B, IN_F), dtype=jnp.float32)
    bound = 1.0 / (IN_F ** 0.5)  # mimic nn.Linear default init
    weight = jax.random.uniform(
        kw, (OUT_F, IN_F), dtype=jnp.float32, minval=-bound, maxval=bound
    )
    label = jax.random.randint(kl, (B,), 0, OUT_F)  # unused, as in the reference module

    ref = x @ weight.T

    # Force the Pallas path even at this tiny size to exercise the kernel.
    out = jax.block_until_ready(linear_header_forward(x, weight, label, use_pallas=True))
    assert out.shape == (B, OUT_F)
    assert jnp.allclose(out, ref, atol=1e-5, rtol=1e-5), "pallas path mismatch"

    # Default dispatch (tiny shape -> plain-JAX fallback) must agree too.
    out_fb = jax.block_until_ready(linear_header_forward(x, weight, label))
    assert jnp.allclose(out_fb, ref, atol=1e-5, rtol=1e-5), "fallback mismatch"

    # Case 2: unaligned shape exercising B/N/K tiling, zero-padding and the f32 accumulator.
    B2, IN2, OUT2 = 160, 640, 272
    x2 = jax.random.normal(kx2, (B2, IN2), dtype=jnp.float32)
    w2 = jax.random.normal(kw2, (OUT2, IN2), dtype=jnp.float32) * (1.0 / IN2 ** 0.5)
    out2 = jax.block_until_ready(linear_header_forward(x2, w2, None, use_pallas=True))
    ref2 = x2 @ w2.T
    assert out2.shape == (B2, OUT2)
    assert jnp.allclose(out2, ref2, atol=1e-3, rtol=1e-3), "tiled path mismatch"

    print("KERNEL_OK")
</pallas_src>

<mosaic_0001>
module attributes {stable_mosaic.version = 11 : i64} {
  func.func @kernel(%arg0: i32, %arg1: i32, %arg2: i32, %arg3: memref<8x128xf32, #tpu.memory_space<vmem>>, %arg4: memref<128x128xf32, #tpu.memory_space<vmem>>, %arg5: memref<8x128xf32, #tpu.memory_space<vmem>>, %arg6: memref<8x128xf32, #tpu.memory_space<vmem>>) attributes {dimension_semantics = [#tpu.dimension_semantics<parallel>, #tpu.dimension_semantics<parallel>, #tpu.dimension_semantics<arbitrary>], iteration_bounds = array<i64: 1, 1, 1>, scalar_prefetch = 0 : i64, scratch_operands = 1 : i64, tpu.core_type = #tpu.core_type<tc>, window_params = [{transform_indices = @transform_0, window_bounds = array<i64: 8, 128>}, {transform_indices = @transform_1, window_bounds = array<i64: 128, 128>}, {transform_indices = @transform_2, window_bounds = array<i64: 8, 128>}]} {
    %c0_i32 = arith.constant 0 : i32
    %0 = arith.cmpi eq, %arg2, %c0_i32 : i32
    %1 = arith.extui %0 : i1 to i32
    %c0_i32_0 = arith.constant 0 : i32
    %2 = arith.cmpi ne, %1, %c0_i32_0 : i32
    scf.if %2 {
      %cst_10 = arith.constant 0.000000e+00 : f32
      %12 = vector.broadcast %cst_10 : f32 to vector<8x128xf32>
      %c0_11 = arith.constant 0 : index
      %c0_12 = arith.constant 0 : index
      %13 = vector.load %arg6[%c0_11, %c0_12] : memref<8x128xf32, #tpu.memory_space<vmem>>, vector<8x128xf32>
      tpu.vector_store %arg6[%c0_11, %c0_12], %12 {strides = array<i32>} : memref<8x128xf32, #tpu.memory_space<vmem>>, vector<8x128xf32>,
    } else {
    }
    %c0 = arith.constant 0 : index
    %c0_1 = arith.constant 0 : index
    %3 = vector.load %arg3[%c0, %c0_1] : memref<8x128xf32, #tpu.memory_space<vmem>>, vector<8x128xf32>
    %c0_2 = arith.constant 0 : index
    %c0_3 = arith.constant 0 : index
    %4 = vector.load %arg4[%c0_2, %c0_3] : memref<128x128xf32, #tpu.memory_space<vmem>>, vector<128x128xf32>
    %c0_4 = arith.constant 0 : index
    %c0_5 = arith.constant 0 : index
    %5 = vector.load %arg6[%c0_4, %c0_5] : memref<8x128xf32, #tpu.memory_space<vmem>>, vector<8x128xf32>
    %cst = arith.constant dense<0.000000e+00> : vector<8x128xf32>
    %6 = tpu.matmul %3, %4, %cst {dimension_numbers = #tpu.dot_dimension_numbers<[1], [1], [0], [0], [0, 0, 1, 0], [], []>} : vector<8x128xf32>, vector<128x128xf32>, vector<8x128xf32> -> vector<8x128xf32>
    %7 = arith.addf %5, %6 : vector<8x128xf32>
    %c0_6 = arith.constant 0 : index
    %c0_7 = arith.constant 0 : index
    %8 = vector.load %arg6[%c0_6, %c0_7] : memref<8x128xf32, #tpu.memory_space<vmem>>, vector<8x128xf32>
    tpu.vector_store %arg6[%c0_6, %c0_7], %7 {strides = array<i32>} : memref<8x128xf32, #tpu.memory_space<vmem>>, vector<8x128xf32>,
    %c0_i32_8 = arith.constant 0 : i32
    %9 = arith.cmpi eq, %arg2, %c0_i32_8 : i32
    %10 = arith.extui %9 : i1 to i32
    %c0_i32_9 = arith.constant 0 : i32
    %11 = arith.cmpi ne, %10, %c0_i32_9 : i32
    scf.if %11 {
      %c0_10 = arith.constant 0 : index
      %c0_11 = arith.constant 0 : index
      %12 = vector.load %arg6[%c0_10, %c0_11] : memref<8x128xf32, #tpu.memory_space<vmem>>, vector<8x128xf32>
      %c0_12 = arith.constant 0 : index
      %c0_13 = arith.constant 0 : index
      %13 = vector.load %arg5[%c0_12, %c0_13] : memref<8x128xf32, #tpu.memory_space<vmem>>, vector<8x128xf32>
      tpu.vector_store %arg5[%c0_12, %c0_13], %12 {strides = array<i32>} : memref<8x128xf32, #tpu.memory_space<vmem>>, vector<8x128xf32>,
    } else {
    }
    return
  }
  func.func @transform_0(%arg0: i32, %arg1: i32, %arg2: i32) -> (i32, i32) {
    %c0_i32 = arith.constant 0 : i32
    return %arg0, %arg2 : i32, i32
  }
  func.func @transform_1(%arg0: i32, %arg1: i32, %arg2: i32) -> (i32, i32) {
    %c0_i32 = arith.constant 0 : i32
    return %arg1, %arg2 : i32, i32
  }
  func.func @transform_2(%arg0: i32, %arg1: i32, %arg2: i32) -> (i32, i32) {
    %c0_i32 = arith.constant 0 : i32
    return %arg0, %arg1 : i32, i32
  }
}

</mosaic_0001>

<bundles_post_ra>
// kernel: tpu_custom_call.1
= control target key start
LH: loop header
LB: loop body
LE: loop exit
PB: predicated region body
PF: predicated region fallthrough
CT: control target
= control target key end

     0   :  { %7 = vsyncpa [#allocation4], 0  ;;  %s222_s0 = inlined_call_operand.hbm [shape: f32[8,128], index: 0, kind: input, shape index: {}]   ;;  %s223_s1 = inlined_call_operand.hbm [shape: f32[128,128], index: 1, kind: input, shape index: {}]   ;;  %s224_s2 = inlined_call_operand.hbm [shape: f32[8,128], index: 2, kind: output, shape index: {}]  }
   0x1   :  { %8 = vsyncpa [#allocation7], 0 }
   0x2   :  { %9 = vsyncpa [#allocation5], 0  ;;  %s15_s11 = sshll.u32 %s222_s0, 4  ;;  %s193_s12 = smov [#allocation3]   ;;  %s16_s11 = int_to_ptr.hbm [resolvable:$true] %s15_s11 }
   0x3   :  { %s17_s13 = sshll.u32 %s193_s12, 4  ;;  %s25_s16 = sshll.u32 %s223_s1, 4  ;;  %s18_s13 = int_to_ptr.vmem [resolvable:$true] %s17_s13  ;;  %s26_s16 = int_to_ptr.hbm [resolvable:$true] %s25_s16 }
   0x4   :  { %20 = dma.hbm_to_vmem [thread:$0]  %s16_s11, 128, %s18_s13, [#allocation4]  }
   0x5   :  { %s194_s17 = smov [#allocation6]   ;;  %s195_s19 = smov 128  }
   0x6   :  { %s27_s18 = sshll.u32 %s194_s17, 4  ;;  %s196_s20 = smov 8   ;;  %s28_s18 = int_to_ptr.vmem [resolvable:$true] %s27_s18 }
   0x7   :  { %33 = dma.hbm_to_vmem [thread:$0]  %s26_s16, 2048, %s28_s18, [#allocation7], %s195_s19, %s195_s19, %s196_s20  }
   0x8   :  { %187 = dma.done.wait [#allocation4], 128  }
   0x9   :  { %188 = vsyncadd [#allocation4], 4294967168 }
   0xa   :  { %189 = dma.done.wait [#allocation7], 2048  }
   0xb   :  { %190 = vsyncadd [#allocation7], 4294965248  ;;  %v63_v0 = vld [vmem:[#allocation6 + $0x78] sm:$0xff]  ;;  %v62_v1 = vld [vmem:[#allocation6 + $0x70] sm:$0xff]  ;;  %s197_s0 = smov [#allocation8]   ;;  %s99_s23 = sshll.u32 %s224_s2, 4  ;;  %s100_s23 = int_to_ptr.hbm [resolvable:$true] %s99_s23 }
   0xc   :  { %65 = vmatpush.xpose.msra.mxu0 %v63_v0  ;;  %v61_v2 = vld [vmem:[#allocation6 + $0x68] sm:$0xff]  ;;  %v60_v3 = vld [vmem:[#allocation6 + $0x60] sm:$0xff]  ;;  %v59_v4 = vld [vmem:[#allocation6 + $0x58] sm:$0xff]  ;;  %s97_s1 = sshll.u32 %s197_s0, 4  ;;  %s98_s1 = int_to_ptr.vmem [resolvable:$true] %s97_s1 }
   0xd   :  { %v58_v5 = vld [vmem:[#allocation6 + $0x50] sm:$0xff]  ;;  %v57_v6 = vld [vmem:[#allocation6 + $0x48] sm:$0xff]  ;;  %v56_v7 = vld [vmem:[#allocation6 + $0x40] sm:$0xff] }
   0xe   :  { %v55_v8 = vld [vmem:[#allocation6 + $0x38] sm:$0xff]  ;;  %v54_v9 = vld [vmem:[#allocation6 + $0x30] sm:$0xff]  ;;  %v53_v10 = vld [vmem:[#allocation6 + $0x28] sm:$0xff] }
   0xf   :  { %v52_v11 = vld [vmem:[#allocation6 + $0x20] sm:$0xff]  ;;  %v51_v12 = vld [vmem:[#allocation6 + $0x18] sm:$0xff]  ;;  %v50_v13 = vld [vmem:[#allocation6 + $0x10] sm:$0xff] }
  0x10   :  { %66 = vmatpush.xpose.msra.mxu0 %v62_v1  ;;  %v49_v14 = vld [vmem:[#allocation6 + $0x8] sm:$0xff]  ;;  %v48_v15 = vld [vmem:[#allocation6] sm:$0xff]  ;;  %v47_v16 = vld [vmem:[#allocation3] sm:$0xff] }
  0x14   :  { %67 = vmatpush.xpose.msra.mxu0 %v61_v2 }
  0x18   :  { %68 = vmatpush.xpose.msra.mxu0 %v60_v3 }
  0x1c   :  { %69 = vmatpush.xpose.msra.mxu0 %v59_v4 }
  0x20   :  { %70 = vmatpush.xpose.msra.mxu0 %v58_v5 }
  0x24   :  { %71 = vmatpush.xpose.msra.mxu0 %v57_v6 }
  0x28   :  { %72 = vmatpush.xpose.msra.mxu0 %v56_v7 }
  0x2c   :  { %73 = vmatpush.xpose.msra.mxu0 %v55_v8 }
  0x30   :  { %74 = vmatpush.xpose.msra.mxu0 %v54_v9 }
  0x34   :  { %75 = vmatpush.xpose.msra.mxu0 %v53_v10 }
  0x38   :  { %76 = vmatpush.xpose.msra.mxu0 %v52_v11 }
  0x3c   :  { %77 = vmatpush.xpose.msra.mxu0 %v51_v12 }
  0x40   :  { %78 = vmatpush.xpose.msra.mxu0 %v50_v13 }
  0x44   :  { %79 = vmatpush.xpose.msra.mxu0 %v49_v14 }
  0x48   :  { %80 = vmatpush.xpose.msra.mxu0 %v48_v15 }
  0x4b   :  { %81 = vmatmul.f32.vlgmr.msra.gmra.mxu0 %v47_v16 }
  0xc8   :  { %v82_v17 = vpop.f32.mrf.mxu0 }
  0xc9   :  { %91 = vst [vmem:[#allocation8] sm:$0xff] %v82_v17 }
  0xca   :  { %102 = dma.vmem_to_hbm [thread:$0]  %s98_s1, 128, %s100_s23, [#allocation5]  }
  0xcb   :  { %191 = dma.done.wait [#allocation5], 128  }
  0xcc   :  { %192 = vsyncadd [#allocation5], 4294967168 }
  0xcd   :  { %107 = vsyncpa [#allocation4], 1 }
  0xce   :  { %108 = vsyncpa [#allocation7], 1 }
  0xcf   :  { %109 = vsyncpa [#allocation5], 1 }

</bundles_post_ra>
